<compile_context>
chip_gen: v7x
topology: tpu7x:2x2x1
jax: 0.10.0
libtpu: 0.0.40
codegen_flags: <defaults>
</compile_context>

<pallas_src>
import jax
import jax.numpy as jnp
from jax.experimental import pallas as pl
from jax.experimental.pallas import tpu as pltpu

_TILE = (8, 128)                 # one full f32 vreg-aligned tile
_INV_2POW23 = 1.0 / 8388608.0    # 2**-23


def _std_normal_icdf_folded(p):
    """Acklam inverse standard-normal CDF, folded by symmetry.

    Computes only the lower half (pf = min(p, 1-p) <= 0.5): one log, one sqrt,
    one rational (single approx reciprocal), then mirrors the sign for p > 0.5.
    p must lie strictly in (0, 1).
    """
    a0, a1, a2 = -3.969683028665376e+01, 2.209460984245205e+02, -2.759285104469687e+02
    a3, a4, a5 = 1.383577518672690e+02, -3.066479806614716e+01, 2.506628277459239e+00
    b0, b1, b2 = -5.447609879822406e+01, 1.615858368580409e+02, -1.556989798598866e+02
    b3, b4 = 6.680131188771972e+01, -1.328068155288572e+01
    c0, c1, c2 = -7.784894002430293e-03, -3.223964580411365e-01, -2.400758277161838e+00
    c3, c4, c5 = -2.549732539343734e+00, 4.374664141464968e+00, 2.938163982698783e+00
    d0, d1, d2, d3 = 7.784695709041462e-03, 3.224671290700398e-01, 2.445134137142996e+00, 3.754408661907416e+00

    p_low = 0.02425
    pf = jnp.minimum(p, 1.0 - p)            # (0, 0.5]

    # Central region (pf >= p_low): q in (-0.5, 0].
    q = pf - 0.5
    r = q * q
    num_c = (((((a0 * r + a1) * r + a2) * r + a3) * r + a4) * r + a5) * q
    den_c = ((((b0 * r + b1) * r + b2) * r + b3) * r + b4) * r + 1.0

    # Tail region (pf < p_low): single lower-tail branch (upper tail deleted).
    t = jnp.sqrt(-2.0 * jnp.log(pf))
    num_t = ((((c0 * t + c1) * t + c2) * t + c3) * t + c4) * t + c5
    den_t = (((d0 * t + d1) * t + d2) * t + d3) * t + 1.0

    in_tail = pf < p_low
    num = jnp.where(in_tail, num_t, num_c)
    den = jnp.where(in_tail, den_t, den_c)
    x_lower = num * pl.reciprocal(den, approx=True)   # value for the lower half (<= 0)
    return jnp.where(p > 0.5, -x_lower, x_lower)


def _confidence_kernel(bits_ref, o_ref):
    bits = bits_ref[...]                               # (8, 128) int32 random bits

    # bits 9..31 -> 23-bit uniform strictly inside (0, 1); arithmetic shift +
    # mask is equivalent to a logical shift and stays in signed int32.
    mant = (bits >> 9) & 0x7FFFFF
    u = mant.astype(jnp.float32) * _INV_2POW23 + (0.5 * _INV_2POW23)
    z = _std_normal_icdf_folded(u)                     # ~ N(0, 1)

    # bit 0 (independent of the mantissa bits) -> Dropout(p=0.5) keep mask in
    # training mode; survivors scaled by 1/(1-p) = 2.
    keep = (bits & 1) == 0
    o_ref[...] = jnp.where(keep, z * 2.0, jnp.zeros_like(z))


def segmentation_model_with_dropout(img, key=None):
    """Forward pass of SegmentationModelWithDropout. `img` is unused (as in PyTorch)."""
    del img  # the PyTorch forward ignores the input image
    if key is None:
        key = jax.random.PRNGKey(0)
    bits_u32 = jax.random.bits(key, _TILE, dtype=jnp.uint32)
    bits = jax.lax.bitcast_convert_type(bits_u32, jnp.int32)

    tile = pl.pallas_call(
        _confidence_kernel,
        out_shape=jax.ShapeDtypeStruct(_TILE, jnp.float32),
        in_specs=[pl.BlockSpec(memory_space=pltpu.MemorySpace.VMEM)],
        out_specs=pl.BlockSpec(memory_space=pltpu.MemorySpace.VMEM),
        # no has_side_effects / grid: output is consumed, single grid point.
    )(bits)

    confidence = tile[0, :8].reshape(1, 2, 2, 2)
    return {'confidence': confidence}


if __name__ == "__main__":
    key = jax.random.PRNGKey(0)
    k_img, k_noise = jax.random.split(key)
    x = jax.random.normal(k_img, (2, 4, 16, 16), dtype=jnp.float32)  # NCHW input, unused by forward

    out = segmentation_model_with_dropout(x, key=k_noise)
    conf = jax.block_until_ready(out['confidence'])

    assert conf.shape == (1, 2, 2, 2), conf.shape
    assert conf.dtype == jnp.float32, conf.dtype
    assert bool(jnp.all(jnp.isfinite(conf)))
    # |2 * N(0,1)| built from a centered 23-bit uniform is bounded by ~11
    assert bool(jnp.all(jnp.abs(conf) < 16.0))
    print("KERNEL_OK")
</pallas_src>

<mosaic_0001>
module attributes {stable_mosaic.version = 11 : i64} {
  func.func @_confidence_kernel(%arg0: memref<8x128xi32, #tpu.memory_space<vmem>>, %arg1: memref<8x128xf32, #tpu.memory_space<vmem>>) attributes {dimension_semantics = [], scalar_prefetch = 0 : i64, scratch_operands = 0 : i64, tpu.core_type = #tpu.core_type<tc>} {
    %c0 = arith.constant 0 : index
    %c0_0 = arith.constant 0 : index
    %0 = vector.load %arg0[%c0, %c0_0] : memref<8x128xi32, #tpu.memory_space<vmem>>, vector<8x128xi32>
    %c9_i32 = arith.constant 9 : i32
    %1 = vector.broadcast %c9_i32 : i32 to vector<8x128xi32>
    %2 = arith.shrsi %0, %1 : vector<8x128xi32>
    %c8388607_i32 = arith.constant 8388607 : i32
    %3 = vector.broadcast %c8388607_i32 : i32 to vector<8x128xi32>
    %4 = arith.andi %2, %3 : vector<8x128xi32>
    %5 = arith.sitofp %4 : vector<8x128xi32> to vector<8x128xf32>
    %cst = arith.constant 1.1920929E-7 : f32
    %6 = vector.broadcast %cst : f32 to vector<8x128xf32>
    %7 = arith.mulf %5, %6 : vector<8x128xf32>
    %cst_1 = arith.constant 5.96046448E-8 : f32
    %8 = vector.broadcast %cst_1 : f32 to vector<8x128xf32>
    %9 = arith.addf %7, %8 : vector<8x128xf32>
    %cst_2 = arith.constant 1.000000e+00 : f32
    %10 = vector.broadcast %cst_2 : f32 to vector<8x128xf32>
    %11 = arith.subf %10, %9 : vector<8x128xf32>
    %12 = arith.minimumf %9, %11 : vector<8x128xf32>
    %cst_3 = arith.constant 5.000000e-01 : f32
    %13 = vector.broadcast %cst_3 : f32 to vector<8x128xf32>
    %14 = arith.subf %12, %13 : vector<8x128xf32>
    %15 = arith.mulf %14, %14 : vector<8x128xf32>
    %cst_4 = arith.constant -39.6968307 : f32
    %16 = vector.broadcast %cst_4 : f32 to vector<8x128xf32>
    %17 = arith.mulf %16, %15 : vector<8x128xf32>
    %cst_5 = arith.constant 220.946106 : f32
    %18 = vector.broadcast %cst_5 : f32 to vector<8x128xf32>
    %19 = arith.addf %17, %18 : vector<8x128xf32>
    %20 = arith.mulf %19, %15 : vector<8x128xf32>
    %cst_6 = arith.constant -275.928497 : f32
    %21 = vector.broadcast %cst_6 : f32 to vector<8x128xf32>
    %22 = arith.addf %20, %21 : vector<8x128xf32>
    %23 = arith.mulf %22, %15 : vector<8x128xf32>
    %cst_7 = arith.constant 138.357758 : f32
    %24 = vector.broadcast %cst_7 : f32 to vector<8x128xf32>
    %25 = arith.addf %23, %24 : vector<8x128xf32>
    %26 = arith.mulf %25, %15 : vector<8x128xf32>
    %cst_8 = arith.constant -30.6647987 : f32
    %27 = vector.broadcast %cst_8 : f32 to vector<8x128xf32>
    %28 = arith.addf %26, %27 : vector<8x128xf32>
    %29 = arith.mulf %28, %15 : vector<8x128xf32>
    %cst_9 = arith.constant 2.50662827 : f32
    %30 = vector.broadcast %cst_9 : f32 to vector<8x128xf32>
    %31 = arith.addf %29, %30 : vector<8x128xf32>
    %32 = arith.mulf %31, %14 : vector<8x128xf32>
    %cst_10 = arith.constant -54.4760971 : f32
    %33 = vector.broadcast %cst_10 : f32 to vector<8x128xf32>
    %34 = arith.mulf %33, %15 : vector<8x128xf32>
    %cst_11 = arith.constant 161.585831 : f32
    %35 = vector.broadcast %cst_11 : f32 to vector<8x128xf32>
    %36 = arith.addf %34, %35 : vector<8x128xf32>
    %37 = arith.mulf %36, %15 : vector<8x128xf32>
    %cst_12 = arith.constant -155.698975 : f32
    %38 = vector.broadcast %cst_12 : f32 to vector<8x128xf32>
    %39 = arith.addf %37, %38 : vector<8x128xf32>
    %40 = arith.mulf %39, %15 : vector<8x128xf32>
    %cst_13 = arith.constant 66.8013153 : f32
    %41 = vector.broadcast %cst_13 : f32 to vector<8x128xf32>
    %42 = arith.addf %40, %41 : vector<8x128xf32>
    %43 = arith.mulf %42, %15 : vector<8x128xf32>
    %cst_14 = arith.constant -13.2806816 : f32
    %44 = vector.broadcast %cst_14 : f32 to vector<8x128xf32>
    %45 = arith.addf %43, %44 : vector<8x128xf32>
    %46 = arith.mulf %45, %15 : vector<8x128xf32>
    %cst_15 = arith.constant 1.000000e+00 : f32
    %47 = vector.broadcast %cst_15 : f32 to vector<8x128xf32>
    %48 = arith.addf %46, %47 : vector<8x128xf32>
    %49 = math.log %12 : vector<8x128xf32>
    %cst_16 = arith.constant -2.000000e+00 : f32
    %50 = vector.broadcast %cst_16 : f32 to vector<8x128xf32>
    %51 = arith.mulf %50, %49 : vector<8x128xf32>
    %52 = math.sqrt %51 : vector<8x128xf32>
    %cst_17 = arith.constant -0.0077848942 : f32
    %53 = vector.broadcast %cst_17 : f32 to vector<8x128xf32>
    %54 = arith.mulf %53, %52 : vector<8x128xf32>
    %cst_18 = arith.constant -0.322396457 : f32
    %55 = vector.broadcast %cst_18 : f32 to vector<8x128xf32>
    %56 = arith.addf %54, %55 : vector<8x128xf32>
    %57 = arith.mulf %56, %52 : vector<8x128xf32>
    %cst_19 = arith.constant -2.40075827 : f32
    %58 = vector.broadcast %cst_19 : f32 to vector<8x128xf32>
    %59 = arith.addf %57, %58 : vector<8x128xf32>
    %60 = arith.mulf %59, %52 : vector<8x128xf32>
    %cst_20 = arith.constant -2.54973245 : f32
    %61 = vector.broadcast %cst_20 : f32 to vector<8x128xf32>
    %62 = arith.addf %60, %61 : vector<8x128xf32>
    %63 = arith.mulf %62, %52 : vector<8x128xf32>
    %cst_21 = arith.constant 4.37466431 : f32
    %64 = vector.broadcast %cst_21 : f32 to vector<8x128xf32>
    %65 = arith.addf %63, %64 : vector<8x128xf32>
    %66 = arith.mulf %65, %52 : vector<8x128xf32>
    %cst_22 = arith.constant 2.938164 : f32
    %67 = vector.broadcast %cst_22 : f32 to vector<8x128xf32>
    %68 = arith.addf %66, %67 : vector<8x128xf32>
    %cst_23 = arith.constant 0.00778469583 : f32
    %69 = vector.broadcast %cst_23 : f32 to vector<8x128xf32>
    %70 = arith.mulf %69, %52 : vector<8x128xf32>
    %cst_24 = arith.constant 0.322467119 : f32
    %71 = vector.broadcast %cst_24 : f32 to vector<8x128xf32>
    %72 = arith.addf %70, %71 : vector<8x128xf32>
    %73 = arith.mulf %72, %52 : vector<8x128xf32>
    %cst_25 = arith.constant 2.44513416 : f32
    %74 = vector.broadcast %cst_25 : f32 to vector<8x128xf32>
    %75 = arith.addf %73, %74 : vector<8x128xf32>
    %76 = arith.mulf %75, %52 : vector<8x128xf32>
    %cst_26 = arith.constant 3.7544086 : f32
    %77 = vector.broadcast %cst_26 : f32 to vector<8x128xf32>
    %78 = arith.addf %76, %77 : vector<8x128xf32>
    %79 = arith.mulf %78, %52 : vector<8x128xf32>
    %cst_27 = arith.constant 1.000000e+00 : f32
    %80 = vector.broadcast %cst_27 : f32 to vector<8x128xf32>
    %81 = arith.addf %79, %80 : vector<8x128xf32>
    %cst_28 = arith.constant 2.425000e-02 : f32
    %82 = vector.broadcast %cst_28 : f32 to vector<8x128xf32>
    %83 = arith.cmpf olt, %12, %82 : vector<8x128xf32>
    %84 = arith.select %83, %68, %32 : vector<8x128xi1>, vector<8x128xf32>
    %85 = arith.select %83, %81, %48 : vector<8x128xi1>, vector<8x128xf32>
    %86 = tpu.reciprocal %85 {approx = true} : vector<8x128xf32> -> vector<8x128xf32>
    %87 = arith.mulf %84, %86 : vector<8x128xf32>
    %cst_29 = arith.constant 5.000000e-01 : f32
    %88 = vector.broadcast %cst_29 : f32 to vector<8x128xf32>
    %89 = arith.cmpf ogt, %9, %88 : vector<8x128xf32>
    %cst_30 = arith.constant 0.000000e+00 : f32
    %90 = vector.broadcast %cst_30 : f32 to vector<8x128xf32>
    %91 = arith.subf %90, %87 : vector<8x128xf32>
    %92 = arith.select %89, %91, %87 : vector<8x128xi1>, vector<8x128xf32>
    %c1_i32 = arith.constant 1 : i32
    %93 = vector.broadcast %c1_i32 : i32 to vector<8x128xi32>
    %94 = arith.andi %0, %93 : vector<8x128xi32>
    %c0_i32 = arith.constant 0 : i32
    %95 = vector.broadcast %c0_i32 : i32 to vector<8x128xi32>
    %96 = arith.cmpi eq, %94, %95 : vector<8x128xi32>
    %cst_31 = arith.constant 2.000000e+00 : f32
    %97 = vector.broadcast %cst_31 : f32 to vector<8x128xf32>
    %98 = arith.mulf %92, %97 : vector<8x128xf32>
    %cst_32 = arith.constant 0.000000e+00 : f32
    %99 = vector.broadcast %cst_32 : f32 to vector<8x128xf32>
    %100 = arith.select %96, %98, %99 : vector<8x128xi1>, vector<8x128xf32>
    %c0_33 = arith.constant 0 : index
    %c0_34 = arith.constant 0 : index
    %101 = vector.load %arg1[%c0_33, %c0_34] : memref<8x128xf32, #tpu.memory_space<vmem>>, vector<8x128xf32>
    tpu.vector_store %arg1[%c0_33, %c0_34], %100 {strides = array<i32>} : memref<8x128xf32, #tpu.memory_space<vmem>>, vector<8x128xf32>,
    return
  }
}

</mosaic_0001>

<bundles_post_ra>
// kernel: tpu_custom_call.1
= control target key start
LH: loop header
LB: loop body
LE: loop exit
PB: predicated region body
PF: predicated region fallthrough
CT: control target
= control target key end

     0   :  { %6 = vsyncpa [#allocation3], 0  ;;  %s211_s0 = inlined_call_operand.hbm [shape: s32[8,128], index: 0, kind: input, shape index: {}]   ;;  %s212_s1 = inlined_call_operand.hbm [shape: f32[8,128], index: 1, kind: output, shape index: {}]  }
   0x1   :  { %7 = vsyncpa [#allocation4], 0  ;;  %s166_s6 = smov [#allocation2]   ;;  %s118_s10 = scalar_lea.hbm %s211_s0, 128 }
   0x2   :  { %s14_s7 = sshll.u32 %s166_s6, 4  ;;  %p119_p0 = scmp.ne.s32.totalorder %s211_s0, %s118_s10  ;;  %s15_s7 = int_to_ptr.vmem [resolvable:$true] %s14_s7 }
   0x3   :  { %p122_p1 = scmp.lt.u32.totalorder %s118_s10, %s211_s0 }
   0x5   :  { %p124_p2 = pnand %p122_p1, %p119_p0 }
   0x7   :  { %127 = shalt.err (!%p124_p2)
}
   0x8   :  { %s128_s15 = scalar_lea.vmem %s15_s7, 128  ;;  %p133_p4 = scmp.lt.s32.totalorder %s15_s7, %s15_s7 }
   0x9   :  { %p129_p3 = scmp.ne.s32.totalorder %s15_s7, %s128_s15  ;;  %p134_p5 = scmp.lt.s32.totalorder %s128_s15, %s128_s15 }
   0xb   :  { %p135_p6 = por %p134_p5, %p133_p4 }
   0xd   :  { %p136_p7 = pnand %p135_p6, %p129_p3 }
   0xf   :  { %139 = shalt.err (!%p136_p7)
}
  0x10   :  { %17 = dma.hbm_to_vmem [thread:$0]  %s211_s0, 128, %s15_s7, [#allocation3]  }
  0x11   :  { %162 = dma.done.wait [#allocation3], 128  }
  0x12   :  { %163 = vsyncadd [#allocation3], 4294967168  ;;  %v190_v0 = vld [vmem:[#allocation2] sm:$0xff]  ;;  %s167_s0 = smov [#allocation5]  }
  0x13   :  { %v108_v1 = vshrl.u32 %v190_v0, 9  ;;  %v88_v60 = vand.u32 1, %v190_v0  ;;  %s99_s18 = sshll.u32 %s167_s0, 4  ;;  %s100_s18 = int_to_ptr.vmem [resolvable:$true] %s99_s18 }
  0x14   :  { %s140_s19 = scalar_lea.vmem %s100_s18, 128  ;;  %p145_p9 = scmp.lt.s32.totalorder %s100_s18, %s100_s18 }
  0x15   :  { %v24_v2 = vcvt.s32.f32 %v108_v1  ;;  %vm89_vm4 = vcmp.eq.s32.totalorder %v88_v60, 0  ;;  %p141_p8 = scmp.ne.s32.totalorder %s100_s18, %s140_s19  ;;  %p146_p10 = scmp.lt.s32.totalorder %s140_s19, %s140_s19 }
  0x17   :  { %v25_v3 = vmul.f32 1.1920929e-07, %v24_v2  ;;  %p147_p11 = por %p146_p10, %p145_p9 }
  0x19   :  { %v193_v4 = vadd.f32 5.9604645e-08, %v25_v3  ;;  %p148_p12 = pnand %p147_p11, %p141_p8 }
  0x1b   :  { %v27_v5 = vsub.f32 1.0, %v193_v4  ;;  %vm85_vm3 = vcmp.gt.f32.partialorder %v193_v4, 0.5 }
  0x1d   :  { %v28_v6 = vmin.f32 %v193_v4, %v27_v5 }
  0x1f   :  { %v109_v7 = vadd.f32 -0.5, %v28_v6  ;;  %112 = vlog2.f32 %v28_v6  ;;  %vm80_vm2 = vcmp.lt.f32.partialorder %v28_v6, 0.02425 }
  0x21   :  { %v30_v8 = vmul.f32 %v109_v7, %v109_v7 }
  0x23   :  { %v42_v9 = vmul.f32 -54.476097, %v30_v8  ;;  %v31_v12 = vmul.f32 -39.69683, %v30_v8 }
  0x25   :  { %v43_v11 = vadd.f32 161.58583, %v42_v9  ;;  %v32_v16 = vadd.f32 220.9461, %v31_v12 }
  0x27   :  { %v44_v15 = vmul.f32 %v43_v11, %v30_v8  ;;  %v33_v18 = vmul.f32 %v32_v16, %v30_v8 }
  0x29   :  { %v113_v10 = vpop.eup %112  ;;  %v45_v17 = vadd.f32 -155.69897, %v44_v15  ;;  %v34_v20 = vadd.f32 -275.9285, %v33_v18 }
  0x2a   :  { %v53_v13 = vmul.f32 0.6931472, %v113_v10 }
  0x2b   :  { %v46_v19 = vmul.f32 %v45_v17, %v30_v8  ;;  %v35_v25 = vmul.f32 %v34_v20, %v30_v8 }
  0x2c   :  { %v54_v14 = vmul.f32 -2.0, %v53_v13 }
  0x2d   :  { %v47_v23 = vadd.f32 66.801315, %v46_v19  ;;  %v36_v31 = vadd.f32 138.35776, %v35_v25 }
  0x2e   :  { %114 = vrsqrt.f32 %v54_v14  ;;  %vm57_vm0 = vcmp.eq.f32.partialorder %v54_v14, inf  ;;  %v60_v22 = vand.u32 2147483648, %v54_v14  ;;  %vm59_vm1 = vcmp.eq.f32.partialorder %v54_v14, 0.0 }
  0x2f   :  { %v48_v28 = vmul.f32 %v47_v23, %v30_v8  ;;  %v37_v37 = vmul.f32 %v36_v31, %v30_v8 }
  0x31   :  { %v49_v34 = vadd.f32 -13.280682, %v48_v28  ;;  %v38_v43 = vadd.f32 -30.664799, %v37_v37 }
  0x33   :  { %v50_v40 = vmul.f32 %v49_v34, %v30_v8  ;;  %v39_v49 = vmul.f32 %v38_v43, %v30_v8 }
  0x35   :  { %v51_v46 = vadd.f32 1.0, %v50_v40  ;;  %v40_v53 = vadd.f32 2.5066283, %v39_v49 }
  0x37   :  { %v41_v55 = vmul.f32 %v109_v7, %v40_v53 }
  0x38   :  { %v115_v21 = vpop.eup %114 }
  0x39   :  { %v56_v24 = vmul.f32 %v115_v21, %v54_v14 }
  0x3b   :  { %v58_v26 = vsel %vm57_vm0, %v54_v14, %v56_v24 }
  0x3c   :  { %v61_v27 = vsel %vm59_vm1, %v60_v22, %v58_v26 }
  0x3d   :  { %v62_v29 = vmul.f32 -0.007784894, %v61_v27  ;;  %v72_v30 = vmul.f32 0.007784696, %v61_v27 }
  0x3f   :  { %v63_v32 = vadd.f32 -0.32239646, %v62_v29  ;;  %v73_v33 = vadd.f32 0.32246712, %v72_v30 }
  0x41   :  { %v64_v35 = vmul.f32 %v63_v32, %v61_v27  ;;  %v74_v36 = vmul.f32 %v73_v33, %v61_v27 }
  0x43   :  { %v65_v38 = vadd.f32 -2.4007583, %v64_v35  ;;  %v75_v39 = vadd.f32 2.4451342, %v74_v36 }
  0x45   :  { %v66_v41 = vmul.f32 %v65_v38, %v61_v27  ;;  %v76_v42 = vmul.f32 %v75_v39, %v61_v27 }
  0x47   :  { %v67_v44 = vadd.f32 -2.5497324, %v66_v41  ;;  %v77_v45 = vadd.f32 3.7544086, %v76_v42 }
  0x49   :  { %v68_v47 = vmul.f32 %v67_v44, %v61_v27  ;;  %v78_v48 = vmul.f32 %v77_v45, %v61_v27 }
  0x4b   :  { %v69_v50 = vadd.f32 4.3746643, %v68_v47  ;;  %v79_v51 = vadd.f32 1.0, %v78_v48 }
  0x4d   :  { %v82_v52 = vsel %vm80_vm2, %v79_v51, %v51_v46  ;;  %v70_v54 = vmul.f32 %v69_v50, %v61_v27 }
  0x4e   :  { %116 = vrcp.f32 %v82_v52 }
  0x4f   :  { %v71_v56 = vadd.f32 2.938164, %v70_v54 }
  0x51   :  { %v81_v57 = vsel %vm80_vm2, %v71_v56, %v41_v55 }
  0x58   :  { %v117_v58 = vpop.eup %116 }
  0x59   :  { %v84_v59 = vmul.f32 %v117_v58, %v81_v57 }
  0x5b   :  { %v86_v61 = vsub.f32 0.0, %v84_v59 }
  0x5d   :  { %v87_v62 = vsel %vm85_vm3, %v86_v61, %v84_v59 }
  0x5e   :  { %v90_v63 = vmul.f32 2.0, %v87_v62 }
  0x60   :  { %v91_v1 = vsel %vm89_vm4, %v90_v63, 0.0 }
  0x61   :  { %92 = vst [vmem:[#allocation5] sm:$0xff] %v91_v1 }
  0x62   :  { %151 = shalt.err (!%p148_p12)
}
  0x63   :  { %s152_s22 = scalar_lea.hbm %s212_s1, 128 }
  0x64   :  { %p153_p13 = scmp.ne.s32.totalorder %s212_s1, %s152_s22  ;;  %p156_p0 = scmp.lt.u32.totalorder %s152_s22, %s212_s1 }
  0x66   :  { %p158_p1 = pnand %p156_p0, %p153_p13 }
  0x68   :  { %161 = shalt.err (!%p158_p1)
}
  0x69   :  { %102 = dma.vmem_to_hbm [thread:$0]  %s100_s18, 128, %s212_s1, [#allocation4]  }
  0x6a   :  { %164 = dma.done.wait [#allocation4], 128  }
  0x6b   :  { %165 = vsyncadd [#allocation4], 4294967168 }
  0x6c   :  { %106 = vsyncpa [#allocation3], 1 }
  0x6d   :  { %107 = vsyncpa [#allocation4], 1 }

</bundles_post_ra>
